<compile_context>
chip_gen: v5e
topology: v5e:2x2
jax: 0.10.0
libtpu: 0.0.40
codegen_flags: <defaults>
</compile_context>

<pallas_src>
import jax
import jax.numpy as jnp
from jax import lax
from jax.experimental import pallas as pl
from jax.experimental.pallas import tpu as pltpu

embedding_size = 10
hidden_size = 8
input_size = 4
num_class = 4
num_layers = 2  # hard-coded as 2 stacked RNN layers in the kernel below


def model_forward(x_ids, params):
    """x_ids: int32 (B, T) token indices in [0, input_size). Returns (B*T, num_class) f32."""
    B, T = x_ids.shape
    V, H, C = input_size, hidden_size, num_class

    # ---- one-time weight fusion (wrapper-side, tiny) ----
    w_in0 = params["emb"] @ params["w_ih0"].T                       # (V, H): embedding ∘ layer-0 input proj
    b0 = (params["b_ih0"] + params["b_hh0"]).reshape(1, H)
    whh0 = params["w_hh0"].T                                        # (H, H)
    w1 = jnp.concatenate([params["w_ih1"].T, params["w_hh1"].T], 0)  # (2H, H): fused layer-1 weights
    b1 = (params["b_ih1"] + params["b_hh1"]).reshape(1, H)
    wfc = params["w_fc"].T                                          # (H, C)
    bfc = params["b_fc"].reshape(1, C)

    # Time-major, flattened compact ids: row index = t*B + b.
    ids_tm = jnp.transpose(x_ids, (1, 0)).reshape(T * B, 1).astype(jnp.int32)

    def kernel(ids_ref, w_in0_ref, whh0_ref, b0_ref, w1_ref, b1_ref,
               wfc_ref, bfc_ref, out_ref):
        ids = ids_ref[...]                                          # (T*B, 1) int32
        # One-hot via iota compare (vocab = 4), kept 2D / lane-friendly.
        onehot = (ids == lax.broadcasted_iota(jnp.int32, (T * B, V), 1)
                  ).astype(jnp.float32)                             # (T*B, V)

        # Embedding lookup + layer-0 input projection + bias: ONE wide MXU matmul.
        pre0 = jnp.dot(onehot, w_in0_ref[...],
                       preferred_element_type=jnp.float32) + b0_ref[...]   # (T*B, H)

        whh0_k = whh0_ref[...]
        w1_k = w1_ref[...]
        b1_full = jnp.broadcast_to(b1_ref[...], (B, H))             # hoisted broadcast

        h1 = jnp.zeros((B, H), jnp.float32)                         # torch.zeros(num_layers, B, H)
        h2 = jnp.zeros((B, H), jnp.float32)
        h2_steps = []
        for t in range(T):  # fully unrolled; 2 dots per step on the serial chain
            # Layer 0: h1 = tanh(pre0_t + h1 @ W_hh0^T)
            h1 = jnp.tanh(pre0[t * B:(t + 1) * B, :]
                          + jnp.dot(h1, whh0_k, preferred_element_type=jnp.float32))
            # Layer 1 (fused): h2 = tanh([h1, h2] @ [W_ih1^T ; W_hh1^T] + b1)
            h2 = jnp.tanh(jnp.dot(jnp.concatenate([h1, h2], axis=-1), w1_k,
                                  preferred_element_type=jnp.float32) + b1_full)
            h2_steps.append(h2)

        # FC head on ALL timesteps at once: one matmul + one store (no per-step slivers).
        h_all = jnp.concatenate(h2_steps, axis=0)                   # (T*B, H) time-major
        out_ref[...] = jnp.dot(h_all, wfc_ref[...],
                               preferred_element_type=jnp.float32) + bfc_ref[...]

    out_tm = pl.pallas_call(
        kernel,
        out_shape=jax.ShapeDtypeStruct((T * B, C), jnp.float32),
        in_specs=[pl.BlockSpec(memory_space=pltpu.MemorySpace.VMEM)] * 8,
        out_specs=pl.BlockSpec(memory_space=pltpu.MemorySpace.VMEM),
    )(ids_tm, w_in0, whh0, b0, w1, b1, wfc, bfc)

    # time-major (T*B, C) -> batch-first (B*T, C), matching torch's x.view(-1, num_class)
    return out_tm.reshape(T, B, C).transpose(1, 0, 2).reshape(B * T, C)


def model_forward_ref(x_ids, params):
    """Pure-JAX reference matching torch.nn.RNN semantics (tanh, 2 layers)."""
    B, T = x_ids.shape
    x = params["emb"][x_ids]                                        # (B, T, E)
    h1 = jnp.zeros((B, hidden_size), jnp.float32)
    h2 = jnp.zeros((B, hidden_size), jnp.float32)
    outs = []
    for t in range(T):
        xt = x[:, t, :]
        h1 = jnp.tanh(xt @ params["w_ih0"].T + params["b_ih0"]
                      + h1 @ params["w_hh0"].T + params["b_hh0"])
        h2 = jnp.tanh(h1 @ params["w_ih1"].T + params["b_ih1"]
                      + h2 @ params["w_hh1"].T + params["b_hh1"])
        outs.append(h2)
    y = jnp.stack(outs, axis=1)                                     # (B, T, H)
    y = y @ params["w_fc"].T + params["b_fc"]                       # (B, T, C)
    return y.reshape(-1, num_class)


def init_params(key):
    ks = jax.random.split(key, 12)
    s = 1.0 / jnp.sqrt(hidden_size)
    u = lambda k, shape: jax.random.uniform(k, shape, jnp.float32, -s, s)
    return {
        "emb":   jax.random.normal(ks[0], (input_size, embedding_size), jnp.float32),
        "w_ih0": u(ks[1], (hidden_size, embedding_size)),
        "w_hh0": u(ks[2], (hidden_size, hidden_size)),
        "b_ih0": u(ks[3], (hidden_size,)),
        "b_hh0": u(ks[4], (hidden_size,)),
        "w_ih1": u(ks[5], (hidden_size, hidden_size)),
        "w_hh1": u(ks[6], (hidden_size, hidden_size)),
        "b_ih1": u(ks[7], (hidden_size,)),
        "b_hh1": u(ks[8], (hidden_size,)),
        "w_fc":  u(ks[9], (num_class, hidden_size)),
        "b_fc":  u(ks[10], (num_class,)),
    }


if __name__ == "__main__":
    key = jax.random.PRNGKey(0)
    k_param, k_x = jax.random.split(key)
    params = init_params(k_param)

    batch, seq = 2, 8
    x_ids = jax.random.randint(k_x, (batch, seq), 0, input_size, dtype=jnp.int32)

    out = jax.block_until_ready(model_forward(x_ids, params))
    ref = jax.block_until_ready(model_forward_ref(x_ids, params))

    assert out.shape == (batch * seq, num_class), out.shape
    assert jnp.allclose(out, ref, atol=1e-3, rtol=1e-3), "mismatch vs reference"
    print("KERNEL_OK")
</pallas_src>

<mosaic_0001>
module attributes {stable_mosaic.version = 11 : i64} {
  func.func @kernel(%arg0: memref<16x1xi32, #tpu.memory_space<vmem>>, %arg1: memref<4x8xf32, #tpu.memory_space<vmem>>, %arg2: memref<8x8xf32, #tpu.memory_space<vmem>>, %arg3: memref<1x8xf32, #tpu.memory_space<vmem>>, %arg4: memref<16x8xf32, #tpu.memory_space<vmem>>, %arg5: memref<1x8xf32, #tpu.memory_space<vmem>>, %arg6: memref<8x4xf32, #tpu.memory_space<vmem>>, %arg7: memref<1x4xf32, #tpu.memory_space<vmem>>, %arg8: memref<16x4xf32, #tpu.memory_space<vmem>>) attributes {dimension_semantics = [], scalar_prefetch = 0 : i64, scratch_operands = 0 : i64, tpu.core_type = #tpu.core_type<tc>} {
    %c0 = arith.constant 0 : index
    %c0_0 = arith.constant 0 : index
    %0 = vector.load %arg0[%c0, %c0_0] : memref<16x1xi32, #tpu.memory_space<vmem>>, vector<16x1xi32>
    %1 = tpu.iota {dimensions = array<i32: 1>} : vector<16x4xi32>
    %2 = vector.broadcast %0 : vector<16x1xi32> to vector<16x4xi32>
    %3 = arith.cmpi eq, %2, %1 : vector<16x4xi32>
    %4 = arith.extui %3 : vector<16x4xi1> to vector<16x4xi32>
    %5 = arith.sitofp %4 : vector<16x4xi32> to vector<16x4xf32>
    %c0_1 = arith.constant 0 : index
    %c0_2 = arith.constant 0 : index
    %6 = vector.load %arg1[%c0_1, %c0_2] : memref<4x8xf32, #tpu.memory_space<vmem>>, vector<4x8xf32>
    %cst = arith.constant dense<0.000000e+00> : vector<16x8xf32>
    %7 = tpu.matmul %5, %6, %cst {dimension_numbers = #tpu.dot_dimension_numbers<[1], [0], [0], [1], [0, 0, 1, 1], [], []>} : vector<16x4xf32>, vector<4x8xf32>, vector<16x8xf32> -> vector<16x8xf32>
    %c0_3 = arith.constant 0 : index
    %c0_4 = arith.constant 0 : index
    %8 = vector.load %arg3[%c0_3, %c0_4] : memref<1x8xf32, #tpu.memory_space<vmem>>, vector<1x8xf32>
    %9 = vector.broadcast %8 : vector<1x8xf32> to vector<16x8xf32>
    %10 = arith.addf %7, %9 : vector<16x8xf32>
    %c0_5 = arith.constant 0 : index
    %c0_6 = arith.constant 0 : index
    %11 = vector.load %arg2[%c0_5, %c0_6] : memref<8x8xf32, #tpu.memory_space<vmem>>, vector<8x8xf32>
    %c0_7 = arith.constant 0 : index
    %c0_8 = arith.constant 0 : index
    %12 = vector.load %arg4[%c0_7, %c0_8] : memref<16x8xf32, #tpu.memory_space<vmem>>, vector<16x8xf32>
    %c0_9 = arith.constant 0 : index
    %c0_10 = arith.constant 0 : index
    %13 = vector.load %arg5[%c0_9, %c0_10] : memref<1x8xf32, #tpu.memory_space<vmem>>, vector<1x8xf32>
    %14 = vector.shape_cast %13 : vector<1x8xf32> to vector<1x8xf32>
    %15 = vector.broadcast %14 : vector<1x8xf32> to vector<2x8xf32>
    %cst_11 = arith.constant 0.000000e+00 : f32
    %16 = vector.broadcast %cst_11 : f32 to vector<2x8xf32>
    %cst_12 = arith.constant 0.000000e+00 : f32
    %17 = vector.broadcast %cst_12 : f32 to vector<2x8xf32>
    %18 = vector.extract_strided_slice %10 {offsets = [0, 0], sizes = [2, 8], strides = [1, 1]} : vector<16x8xf32> to vector<2x8xf32>
    %cst_13 = arith.constant dense<0.000000e+00> : vector<2x8xf32>
    %19 = tpu.matmul %16, %11, %cst_13 {dimension_numbers = #tpu.dot_dimension_numbers<[1], [0], [0], [1], [0, 0, 1, 1], [], []>} : vector<2x8xf32>, vector<8x8xf32>, vector<2x8xf32> -> vector<2x8xf32>
    %20 = arith.addf %18, %19 : vector<2x8xf32>
    %21 = math.tanh %20 : vector<2x8xf32>
    %22 = tpu.concatenate %21, %17 in 1 : vector<2x8xf32>, vector<2x8xf32> -> vector<2x16xf32>
    %cst_14 = arith.constant dense<0.000000e+00> : vector<2x8xf32>
    %23 = tpu.matmul %22, %12, %cst_14 {dimension_numbers = #tpu.dot_dimension_numbers<[1], [0], [0], [1], [0, 0, 1, 1], [], []>} : vector<2x16xf32>, vector<16x8xf32>, vector<2x8xf32> -> vector<2x8xf32>
    %24 = arith.addf %23, %15 : vector<2x8xf32>
    %25 = math.tanh %24 : vector<2x8xf32>
    %26 = vector.extract_strided_slice %10 {offsets = [2, 0], sizes = [2, 8], strides = [1, 1]} : vector<16x8xf32> to vector<2x8xf32>
    %cst_15 = arith.constant dense<0.000000e+00> : vector<2x8xf32>
    %27 = tpu.matmul %21, %11, %cst_15 {dimension_numbers = #tpu.dot_dimension_numbers<[1], [0], [0], [1], [0, 0, 1, 1], [], []>} : vector<2x8xf32>, vector<8x8xf32>, vector<2x8xf32> -> vector<2x8xf32>
    %28 = arith.addf %26, %27 : vector<2x8xf32>
    %29 = math.tanh %28 : vector<2x8xf32>
    %30 = tpu.concatenate %29, %25 in 1 : vector<2x8xf32>, vector<2x8xf32> -> vector<2x16xf32>
    %cst_16 = arith.constant dense<0.000000e+00> : vector<2x8xf32>
    %31 = tpu.matmul %30, %12, %cst_16 {dimension_numbers = #tpu.dot_dimension_numbers<[1], [0], [0], [1], [0, 0, 1, 1], [], []>} : vector<2x16xf32>, vector<16x8xf32>, vector<2x8xf32> -> vector<2x8xf32>
    %32 = arith.addf %31, %15 : vector<2x8xf32>
    %33 = math.tanh %32 : vector<2x8xf32>
    %34 = vector.extract_strided_slice %10 {offsets = [4, 0], sizes = [2, 8], strides = [1, 1]} : vector<16x8xf32> to vector<2x8xf32>
    %cst_17 = arith.constant dense<0.000000e+00> : vector<2x8xf32>
    %35 = tpu.matmul %29, %11, %cst_17 {dimension_numbers = #tpu.dot_dimension_numbers<[1], [0], [0], [1], [0, 0, 1, 1], [], []>} : vector<2x8xf32>, vector<8x8xf32>, vector<2x8xf32> -> vector<2x8xf32>
    %36 = arith.addf %34, %35 : vector<2x8xf32>
    %37 = math.tanh %36 : vector<2x8xf32>
    %38 = tpu.concatenate %37, %33 in 1 : vector<2x8xf32>, vector<2x8xf32> -> vector<2x16xf32>
    %cst_18 = arith.constant dense<0.000000e+00> : vector<2x8xf32>
    %39 = tpu.matmul %38, %12, %cst_18 {dimension_numbers = #tpu.dot_dimension_numbers<[1], [0], [0], [1], [0, 0, 1, 1], [], []>} : vector<2x16xf32>, vector<16x8xf32>, vector<2x8xf32> -> vector<2x8xf32>
    %40 = arith.addf %39, %15 : vector<2x8xf32>
    %41 = math.tanh %40 : vector<2x8xf32>
    %42 = vector.extract_strided_slice %10 {offsets = [6, 0], sizes = [2, 8], strides = [1, 1]} : vector<16x8xf32> to vector<2x8xf32>
    %cst_19 = arith.constant dense<0.000000e+00> : vector<2x8xf32>
    %43 = tpu.matmul %37, %11, %cst_19 {dimension_numbers = #tpu.dot_dimension_numbers<[1], [0], [0], [1], [0, 0, 1, 1], [], []>} : vector<2x8xf32>, vector<8x8xf32>, vector<2x8xf32> -> vector<2x8xf32>
    %44 = arith.addf %42, %43 : vector<2x8xf32>
    %45 = math.tanh %44 : vector<2x8xf32>
    %46 = tpu.concatenate %45, %41 in 1 : vector<2x8xf32>, vector<2x8xf32> -> vector<2x16xf32>
    %cst_20 = arith.constant dense<0.000000e+00> : vector<2x8xf32>
    %47 = tpu.matmul %46, %12, %cst_20 {dimension_numbers = #tpu.dot_dimension_numbers<[1], [0], [0], [1], [0, 0, 1, 1], [], []>} : vector<2x16xf32>, vector<16x8xf32>, vector<2x8xf32> -> vector<2x8xf32>
    %48 = arith.addf %47, %15 : vector<2x8xf32>
    %49 = math.tanh %48 : vector<2x8xf32>
    %50 = vector.extract_strided_slice %10 {offsets = [8, 0], sizes = [2, 8], strides = [1, 1]} : vector<16x8xf32> to vector<2x8xf32>
    %cst_21 = arith.constant dense<0.000000e+00> : vector<2x8xf32>
    %51 = tpu.matmul %45, %11, %cst_21 {dimension_numbers = #tpu.dot_dimension_numbers<[1], [0], [0], [1], [0, 0, 1, 1], [], []>} : vector<2x8xf32>, vector<8x8xf32>, vector<2x8xf32> -> vector<2x8xf32>
    %52 = arith.addf %50, %51 : vector<2x8xf32>
    %53 = math.tanh %52 : vector<2x8xf32>
    %54 = tpu.concatenate %53, %49 in 1 : vector<2x8xf32>, vector<2x8xf32> -> vector<2x16xf32>
    %cst_22 = arith.constant dense<0.000000e+00> : vector<2x8xf32>
    %55 = tpu.matmul %54, %12, %cst_22 {dimension_numbers = #tpu.dot_dimension_numbers<[1], [0], [0], [1], [0, 0, 1, 1], [], []>} : vector<2x16xf32>, vector<16x8xf32>, vector<2x8xf32> -> vector<2x8xf32>
    %56 = arith.addf %55, %15 : vector<2x8xf32>
    %57 = math.tanh %56 : vector<2x8xf32>
    %58 = vector.extract_strided_slice %10 {offsets = [10, 0], sizes = [2, 8], strides = [1, 1]} : vector<16x8xf32> to vector<2x8xf32>
    %cst_23 = arith.constant dense<0.000000e+00> : vector<2x8xf32>
    %59 = tpu.matmul %53, %11, %cst_23 {dimension_numbers = #tpu.dot_dimension_numbers<[1], [0], [0], [1], [0, 0, 1, 1], [], []>} : vector<2x8xf32>, vector<8x8xf32>, vector<2x8xf32> -> vector<2x8xf32>
    %60 = arith.addf %58, %59 : vector<2x8xf32>
    %61 = math.tanh %60 : vector<2x8xf32>
    %62 = tpu.concatenate %61, %57 in 1 : vector<2x8xf32>, vector<2x8xf32> -> vector<2x16xf32>
    %cst_24 = arith.constant dense<0.000000e+00> : vector<2x8xf32>
    %63 = tpu.matmul %62, %12, %cst_24 {dimension_numbers = #tpu.dot_dimension_numbers<[1], [0], [0], [1], [0, 0, 1, 1], [], []>} : vector<2x16xf32>, vector<16x8xf32>, vector<2x8xf32> -> vector<2x8xf32>
    %64 = arith.addf %63, %15 : vector<2x8xf32>
    %65 = math.tanh %64 : vector<2x8xf32>
    %66 = vector.extract_strided_slice %10 {offsets = [12, 0], sizes = [2, 8], strides = [1, 1]} : vector<16x8xf32> to vector<2x8xf32>
    %cst_25 = arith.constant dense<0.000000e+00> : vector<2x8xf32>
    %67 = tpu.matmul %61, %11, %cst_25 {dimension_numbers = #tpu.dot_dimension_numbers<[1], [0], [0], [1], [0, 0, 1, 1], [], []>} : vector<2x8xf32>, vector<8x8xf32>, vector<2x8xf32> -> vector<2x8xf32>
    %68 = arith.addf %66, %67 : vector<2x8xf32>
    %69 = math.tanh %68 : vector<2x8xf32>
    %70 = tpu.concatenate %69, %65 in 1 : vector<2x8xf32>, vector<2x8xf32> -> vector<2x16xf32>
    %cst_26 = arith.constant dense<0.000000e+00> : vector<2x8xf32>
    %71 = tpu.matmul %70, %12, %cst_26 {dimension_numbers = #tpu.dot_dimension_numbers<[1], [0], [0], [1], [0, 0, 1, 1], [], []>} : vector<2x16xf32>, vector<16x8xf32>, vector<2x8xf32> -> vector<2x8xf32>
    %72 = arith.addf %71, %15 : vector<2x8xf32>
    %73 = math.tanh %72 : vector<2x8xf32>
    %74 = vector.extract_strided_slice %10 {offsets = [14, 0], sizes = [2, 8], strides = [1, 1]} : vector<16x8xf32> to vector<2x8xf32>
    %cst_27 = arith.constant dense<0.000000e+00> : vector<2x8xf32>
    %75 = tpu.matmul %69, %11, %cst_27 {dimension_numbers = #tpu.dot_dimension_numbers<[1], [0], [0], [1], [0, 0, 1, 1], [], []>} : vector<2x8xf32>, vector<8x8xf32>, vector<2x8xf32> -> vector<2x8xf32>
    %76 = arith.addf %74, %75 : vector<2x8xf32>
    %77 = math.tanh %76 : vector<2x8xf32>
    %78 = tpu.concatenate %77, %73 in 1 : vector<2x8xf32>, vector<2x8xf32> -> vector<2x16xf32>
    %cst_28 = arith.constant dense<0.000000e+00> : vector<2x8xf32>
    %79 = tpu.matmul %78, %12, %cst_28 {dimension_numbers = #tpu.dot_dimension_numbers<[1], [0], [0], [1], [0, 0, 1, 1], [], []>} : vector<2x16xf32>, vector<16x8xf32>, vector<2x8xf32> -> vector<2x8xf32>
    %80 = arith.addf %79, %15 : vector<2x8xf32>
    %81 = math.tanh %80 : vector<2x8xf32>
    %82 = tpu.concatenate %25, %33, %41, %49, %57, %65, %73, %81 in 0 : vector<2x8xf32>, vector<2x8xf32>, vector<2x8xf32>, vector<2x8xf32>, vector<2x8xf32>, vector<2x8xf32>, vector<2x8xf32>, vector<2x8xf32> -> vector<16x8xf32>
    %c0_29 = arith.constant 0 : index
    %c0_30 = arith.constant 0 : index
    %83 = vector.load %arg6[%c0_29, %c0_30] : memref<8x4xf32, #tpu.memory_space<vmem>>, vector<8x4xf32>
    %cst_31 = arith.constant dense<0.000000e+00> : vector<16x4xf32>
    %84 = tpu.matmul %82, %83, %cst_31 {dimension_numbers = #tpu.dot_dimension_numbers<[1], [0], [0], [1], [0, 0, 1, 1], [], []>} : vector<16x8xf32>, vector<8x4xf32>, vector<16x4xf32> -> vector<16x4xf32>
    %c0_32 = arith.constant 0 : index
    %c0_33 = arith.constant 0 : index
    %85 = vector.load %arg7[%c0_32, %c0_33] : memref<1x4xf32, #tpu.memory_space<vmem>>, vector<1x4xf32>
    %86 = vector.broadcast %85 : vector<1x4xf32> to vector<16x4xf32>
    %87 = arith.addf %84, %86 : vector<16x4xf32>
    %c0_34 = arith.constant 0 : index
    %c0_35 = arith.constant 0 : index
    %88 = vector.load %arg8[%c0_34, %c0_35] : memref<16x4xf32, #tpu.memory_space<vmem>>, vector<16x4xf32>
    tpu.vector_store %arg8[%c0_34, %c0_35], %87 {strides = array<i32>} : memref<16x4xf32, #tpu.memory_space<vmem>>, vector<16x4xf32>,
    return
  }
}

</mosaic_0001>

<bundles_post_ra>
// kernel: tpu_custom_call.1
= control target key start
LH: loop header
LB: loop body
LE: loop exit
PB: predicated region body
PF: predicated region fallthrough
CT: control target
= control target key end

     0   :  { %v679_v0 = vmov 0   ;;  %vm57_vm0 = vcmask 1043456   ;;  %v680_v4 = vmov 0.0   ;;  %v31_v5 = vlaneseq  ;;  %s681_s15 = smov 8   ;;  %s869_s0 = inlined_call_operand.vmem [shape: s32[16,1], index: 0, kind: input, shape index: {}]   ;;  %s870_s3 = inlined_call_operand.vmem [shape: f32[1,8], index: 3, kind: input, shape index: {}]   ;;  %s871_s1 = inlined_call_operand.vmem [shape: f32[4,8], index: 1, kind: input, shape index: {}]   ;;  %s872_s2 = inlined_call_operand.vmem [shape: f32[8,8], index: 2, kind: input, shape index: {}]   ;;  %s873_s5 = inlined_call_operand.vmem [shape: f32[1,8], index: 5, kind: input, shape index: {}]   ;;  %s874_s4 = inlined_call_operand.vmem [shape: f32[16,8], index: 4, kind: input, shape index: {}]   ;;  %s875_s6 = inlined_call_operand.vmem [shape: f32[8,4], index: 6, kind: input, shape index: {}]   ;;  %s876_s7 = inlined_call_operand.vmem [shape: f32[1,4], index: 7, kind: input, shape index: {}]   ;;  %s877_s8 = inlined_call_operand.vmem [shape: f32[16,4], index: 8, kind: output, shape index: {}]  }
   0x1   :  { %642 = vset.pattern.permute.xlu0 %v679_v0  ;;  %v29_v1 = vld [vmem:[%s869_s0] sm:$0xff]  ;;  %643 = vset.pattern.permute.xlu1 %v679_v0  ;;  %vm50_vm1 = vcmask 31744   ;;  %v753_v9 = vld [vmem:[%s874_s4 + $0x8] sm:$0xff]  ;;  %vm91_vm3 = vcmask 64512   ;;  %vm118_vm4 = vcmask 130048   ;;  %vm569_vm6 = vcmask 1041408  }
   0x2   :  { %34 = vperm.xlu0 %642, %v29_v1   ;;  %v45_v2 = vld [vmem:[%s871_s1] sm:$0xf]  ;;  %v744_v6 = vand.u32 127, %v31_v5  ;;  %136 = vmatpush.msra.mxu2 %v753_v9  ;;  %v30_v35 = vld [vmem:[%s869_s0 + $0x8] sm:$0xff]  ;;  %vm572_vm7 = vcmask 1045504  }
   0x3   :  { %619 = vmatpush.msk.msra.mxu0 %vm57_vm0, %v45_v2  ;;  %v737_v3 = vld [vmem:[%s872_s2] sm:$0xff] }
   0x4   :  { %110 = vmatpush.msra.mxu1 %v737_v3  ;;  %221 = vmatpush.msra.mxu3 %v737_v3  ;;  %v758_v10 = vld [vmem:[%s874_s4] sm:$0xff] }
   0x5   :  { %111 = vmatmul.f32.vlgmr.msra.gmra.mxu1 %v680_v4  ;;  %281 = vmatpush.msrb.mxu0 %v737_v3  ;;  %v770_v11 = vld [vmem:[%s870_s3] ss:$0 sm:$0xff] }
   0x6   :  { %341 = vmatpush.msrb.mxu3 %v737_v3  ;;  %195 = vmatpush.msrb.mxu1 %v753_v9  ;;  %v786_v18 = vld [vmem:[%s873_s5] ss:$0 sm:$0xff] }
   0x7   :  { %137 = vmatpush.msra.mxu2 %v758_v10 }
   0x8   :  { %196 = vmatpush.msrb.mxu1 %v758_v10 }
   0x9   :  { %161 = vmatpush.msrb.mxu2 %v737_v3 }
   0xa   :  { %315 = vmatpush.msra.mxu1 %v753_v9 }
   0xc   :  { %316 = vmatpush.msra.mxu1 %v758_v10 }
  0x74   :  { %v35_v7 = vpop.permute.xlu0 %34 }
  0x75   :  { %vm39_vm2 = vcmp.eq.s32.totalorder %v35_v7, %v744_v6 }
  0x76   :  { %v617_v8 = vsel %vm39_vm2, 1.0, %v680_v4 }
  0x77   :  { %620 = vmatmul.msk.f32.vlgmr.msra.gmra.mxu0 %vm50_vm1, %v617_v8  ;;  %v577_v8 = vld [vmem:[%s875_s6] sm:$0xff] }
  0x78   :  { %395 = vmatpush.msra.mxu0 %v737_v3 }
  0x82   :  { %v112_v13 = vpop.f32.mrf.mxu1 }
  0xf4   :  { %v78_v12 = vpop.f32.mrf.mxu0 }
  0xf5   :  { %v773_v14 = vadd.f32 %v770_v11, %v78_v12 }
  0xf7   :  { %v115_v15 = vadd.f32 %v112_v13, %v773_v14 }
  0xf9   :  { %647 = vtanh.f32 %v115_v15 }
  0xff   :  { %v648_v16 = vpop.eup %647 }
 0x100   :  { %v117_v17 = vsel %vm91_vm3, %v648_v16, 0.0 }
 0x101   :  { %622 = vmatmul.msk.f32.vlgmr.msra.gmra.mxu2 %vm118_vm4, %v117_v17 }
 0x102   :  { %255 = vmatpush.msra.mxu2 %v753_v9 }
 0x104   :  { %256 = vmatpush.msra.mxu2 %v758_v10 }
 0x109   :  { %623 = vmatmul.msk.f32.vlgmr.msrb.gmra.mxu2 %vm91_vm3, %v648_v16 }
 0x10a   :  { %370 = vmatpush.msrb.mxu2 %v753_v9 }
 0x10c   :  { %371 = vmatpush.msrb.mxu2 %v758_v10 }
 0x184   :  { %v139_v19 = vpop.f32.mrf.mxu2 }
 0x185   :  { %v140_v20 = vadd.f32 %v786_v18, %v139_v19 }
 0x187   :  { %649 = vtanh.f32 %v140_v20  ;;  %v646_v20 = vld [vmem:[%s876_s7] ss:$0 sm:$0xff] }
 0x18c   :  { %v163_v21 = vpop.f32.mrf.mxu2 }
 0x18d   :  { %v650_v22 = vpop.eup %649  ;;  %v167_v23 = vrot.slane %v163_v21, 6 }
 0x18e   :  { %v172_v24 = vrot.slane %v650_v22, 6 }
 0x18f   :  { %v169_v25 = vadd.f32 %v167_v23, %v773_v14 }
 0x190   :  { %173 = vrot.lane.b32.xlu0 %v172_v24, %s681_s15 }
 0x191   :  { %651 = vtanh.f32 %v169_v25 }
 0x197   :  { %v652_v26 = vpop.eup %651 }
 0x198   :  { %v203_v27 = vrot.slane %v652_v26, 2 }
 0x19a   :  { %625 = vmatmul.msk.f32.vlgmr.msra.gmra.mxu3 %vm91_vm3, %v203_v27 }
 0x19b   :  { %455 = vmatpush.msra.mxu3 %v737_v3 }
 0x202   :  { %v174_v28 = vpop.permute.xlu0 %173 }
 0x203   :  { %v176_v29 = vsel %vm91_vm3, %v652_v26, %v174_v28 }
 0x204   :  { %v178_v30 = vrot.slane %v176_v29, 2 }
 0x206   :  { %624 = vmatmul.msk.f32.vlgmr.msrb.gmra.mxu1 %vm118_vm4, %v178_v30 }
 0x207   :  { %429 = vmatpush.msrb.mxu1 %v753_v9 }
 0x209   :  { %430 = vmatpush.msrb.mxu1 %v758_v10 }
 0x21d   :  { %v223_v36 = vpop.f32.mrf.mxu3 }
 0x21e   :  { %v227_v37 = vrot.slane %v223_v36, 4 }
 0x220   :  { %v229_v38 = vadd.f32 %v227_v37, %v773_v14 }
 0x283   :  { %v198_v31 = vpop.f32.mrf.mxu1 }
 0x284   :  { %v199_v32 = vadd.f32 %v786_v18, %v198_v31 }
 0x286   :  { %653 = vtanh.f32 %v199_v32 }
 0x287   :  { %655 = vtanh.f32 %v229_v38 }
 0x28c   :  { %v654_v33 = vpop.eup %653 }
 0x28d   :  { %v232_v34 = vrot.slane %v654_v33, 4  ;;  %v656_v39 = vpop.eup %655  ;;  %v556_v49 = vrot.slane %v654_v33, 6 }
 0x28e   :  { %v263_v45 = vrot.slane %v656_v39, 4 }
 0x28f   :  { %233 = vrot.lane.b32.xlu1 %v232_v34, %s681_s15  ;;  %v570_v55 = vsel %vm569_vm6, %v650_v22, %v556_v49 }
 0x297   :  { %37 = vperm.xlu1 %643, %v30_v35  }
 0x301   :  { %v234_v40 = vpop.permute.xlu1 %233 }
 0x302   :  { %v236_v41 = vsel %vm91_vm3, %v656_v39, %v234_v40 }
 0x303   :  { %v238_v42 = vrot.slane %v236_v41, 4 }
 0x305   :  { %626 = vmatmul.msk.f32.vlgmr.msra.gmra.mxu2 %vm118_vm4, %v238_v42 }
 0x306   :  { %489 = vmatpush.msra.mxu2 %v753_v9 }
 0x308   :  { %490 = vmatpush.msra.mxu2 %v758_v10 }
 0x309   :  { %v38_v43 = vpop.permute.xlu1 %37 }
 0x30a   :  { %vm40_vm5 = vcmp.eq.s32.totalorder %v38_v43, %v744_v6 }
 0x30b   :  { %v618_v44 = vsel %vm40_vm5, 1.0, %v680_v4 }
 0x30c   :  { %621 = vmatmul.msk.f32.gmra.mxu0 %vm50_vm1, %v618_v44 }
 0x314   :  { %627 = vmatmul.msk.f32.vlgmr.msrb.gmra.mxu0 %vm91_vm3, %v263_v45 }
 0x315   :  { %515 = vmatpush.msrb.mxu0 %v737_v3 }
 0x388   :  { %v258_v46 = vpop.f32.mrf.mxu2 }
 0x389   :  { %v259_v47 = vadd.f32 %v786_v18, %v258_v46  ;;  %v81_v48 = vpop.f32.mrf.mxu0 }
 0x38a   :  { %v823_v63 = vadd.f32 %v770_v11, %v81_v48 }
 0x38b   :  { %657 = vtanh.f32 %v259_v47 }
 0x391   :  { %v658_v50 = vpop.eup %657  ;;  %v283_v51 = vpop.f32.mrf.mxu0 }
 0x392   :  { %v558_v52 = vrot.slane %v658_v50, 4  ;;  %v287_v53 = vrot.slane %v283_v51, 2  ;;  %v292_v54 = vrot.slane %v658_v50, 2 }
 0x394   :  { %v289_v56 = vadd.f32 %v287_v53, %v773_v14  ;;  %293 = vrot.lane.b32.xlu2 %v292_v54, %s681_s15  ;;  %v571_v57 = vsel %vm57_vm0, %v570_v55, %v558_v52 }
 0x396   :  { %659 = vtanh.f32 %v289_v56 }
 0x39c   :  { %v660_v58 = vpop.eup %659 }
 0x39d   :  { %v323_v59 = vrot.slane %v660_v58, 6 }
 0x39f   :  { %629 = vmatmul.msk.f32.vlgmr.msrb.gmra.mxu3 %vm91_vm3, %v323_v59 }
 0x3a0   :  { %603 = vmatpush.msrb.mxu3 %v577_v8 }
 0x3ee   :  { %v294_v60 = vpop.permute.xlu2 %293 }
 0x3ef   :  { %v296_v61 = vsel %vm91_vm3, %v660_v58, %v294_v60 }
 0x3f0   :  { %v298_v62 = vrot.slane %v296_v61, 6 }
 0x3f2   :  { %628 = vmatmul.msk.f32.vlgmr.msra.gmra.mxu1 %vm118_vm4, %v298_v62 }
 0x3f3   :  { %549 = vmatpush.msra.mxu1 %v753_v9 }
 0x3f5   :  { %550 = vmatpush.msra.mxu1 %v758_v10 }
 0x422   :  { %v343_v0 = vpop.f32.mrf.mxu3 }
 0x423   :  { %v346_v1 = vadd.f32 %v343_v0, %v823_v63 }
 0x425   :  { %661 = vtanh.f32 %v346_v1 }
 0x42b   :  { %v662_v2 = vpop.eup %661 }
 0x42c   :  { %631 = vmatmul.msk.f32.vlgmr.msra.gmra.mxu0 %vm91_vm3, %v662_v2 }
 0x46f   :  { %v318_v3 = vpop.f32.mrf.mxu1 }
 0x470   :  { %v319_v4 = vadd.f32 %v786_v18, %v318_v3 }
 0x472   :  { %663 = vtanh.f32 %v319_v4 }
 0x478   :  { %v664_v5 = vpop.eup %663 }
 0x479   :  { %v560_v6 = vrot.slane %v664_v5, 2  ;;  %349 = vrot.lane.b32.xlu2 %v664_v5, %s681_s15 }
 0x47b   :  { %v573_v7 = vsel %vm572_vm7, %v571_v57, %v560_v6 }
 0x4a9   :  { %v397_v9 = vpop.f32.mrf.mxu0 }
 0x4aa   :  { %v401_v10 = vrot.slane %v397_v9, 6 }
 0x4ac   :  { %v403_v11 = vadd.f32 %v401_v10, %v823_v63 }
 0x4ae   :  { %665 = vtanh.f32 %v403_v11 }
 0x4b4   :  { %v666_v12 = vpop.eup %665 }
 0x4b5   :  { %v437_v13 = vrot.slane %v666_v12, 2 }
 0x4b7   :  { %633 = vmatmul.msk.f32.vlgmr.msra.gmra.mxu3 %vm91_vm3, %v437_v13 }
 0x4bf   :  { %637 = vmatmul.msk.f32.vlgmr.msrb.gmra.mxu3 %vm91_vm3, %v573_v7 }
 0x4d3   :  { %v350_v14 = vpop.permute.xlu2 %349 }
 0x4d4   :  { %v352_v15 = vsel %vm91_vm3, %v662_v2, %v350_v14 }
 0x4d5   :  { %630 = vmatmul.msk.f32.vlgmr.msrb.gmra.mxu2 %vm118_vm4, %v352_v15 }
 0x53a   :  { %v457_v16 = vpop.f32.mrf.mxu3 }
 0x53b   :  { %v461_v17 = vrot.slane %v457_v16, 4 }
 0x53d   :  { %v463_v19 = vadd.f32 %v461_v17, %v823_v63 }
 0x53f   :  { %667 = vtanh.f32 %v463_v19 }
 0x542   :  { %v605_v21 = vpop.f32.mrf.mxu3 }
 0x543   :  { %v606_v22 = vadd.f32 %v646_v20, %v605_v21 }
 0x545   :  { %v668_v23 = vpop.eup %667  ;;  %611 = vst.msk [vmem:[%s877_s8] sm:$0xff] %vm50_vm1, %v606_v22 }
 0x546   :  { %v497_v24 = vrot.slane %v668_v23, 4 }
 0x548   :  { %635 = vmatmul.msk.f32.vlgmr.msrb.gmra.mxu0 %vm91_vm3, %v497_v24 }
 0x558   :  { %v373_v25 = vpop.f32.mrf.mxu2 }
 0x559   :  { %v374_v26 = vadd.f32 %v786_v18, %v373_v25 }
 0x55b   :  { %669 = vtanh.f32 %v374_v26 }
 0x561   :  { %v670_v27 = vpop.eup %669 }
 0x562   :  { %v406_v28 = vrot.slane %v670_v27, 6 }
 0x564   :  { %407 = vrot.lane.b32.xlu0 %v406_v28, %s681_s15 }
 0x5c5   :  { %v517_v47 = vpop.f32.mrf.mxu0 }
 0x5c6   :  { %v521_v48 = vrot.slane %v517_v47, 2 }
 0x5c8   :  { %v523_v49 = vadd.f32 %v521_v48, %v823_v63 }
 0x5d6   :  { %v408_v29 = vpop.permute.xlu0 %407 }
 0x5d7   :  { %v410_v30 = vsel %vm91_vm3, %v666_v12, %v408_v29 }
 0x5d8   :  { %v412_v31 = vrot.slane %v410_v30, 2 }
 0x5da   :  { %632 = vmatmul.msk.f32.vlgmr.msrb.gmra.mxu1 %vm118_vm4, %v412_v31 }
 0x657   :  { %v432_v32 = vpop.f32.mrf.mxu1 }
 0x658   :  { %v433_v33 = vadd.f32 %v786_v18, %v432_v32 }
 0x65a   :  { %671 = vtanh.f32 %v433_v33 }
 0x660   :  { %v672_v34 = vpop.eup %671 }
 0x661   :  { %v466_v35 = vrot.slane %v672_v34, 4  ;;  %v562_v41 = vrot.slane %v672_v34, 6 }
 0x663   :  { %467 = vrot.lane.b32.xlu1 %v466_v35, %s681_s15  ;;  %v574_v45 = vsel %vm569_vm6, %v670_v27, %v562_v41 }
 0x6d5   :  { %v468_v36 = vpop.permute.xlu1 %467 }
 0x6d6   :  { %v470_v37 = vsel %vm91_vm3, %v668_v23, %v468_v36 }
 0x6d7   :  { %v472_v38 = vrot.slane %v470_v37, 4 }
 0x6d9   :  { %634 = vmatmul.msk.f32.vlgmr.msra.gmra.mxu2 %vm118_vm4, %v472_v38 }
 0x75c   :  { %v492_v39 = vpop.f32.mrf.mxu2 }
 0x75d   :  { %v493_v40 = vadd.f32 %v786_v18, %v492_v39 }
 0x75f   :  { %673 = vtanh.f32 %v493_v40 }
 0x760   :  { %675 = vtanh.f32 %v523_v49 }
 0x765   :  { %v674_v42 = vpop.eup %673 }
 0x766   :  { %v564_v43 = vrot.slane %v674_v42, 4  ;;  %v526_v44 = vrot.slane %v674_v42, 2  ;;  %v676_v50 = vpop.eup %675 }
 0x768   :  { %527 = vrot.lane.b32.xlu2 %v526_v44, %s681_s15  ;;  %v575_v46 = vsel %vm57_vm0, %v574_v45, %v564_v43 }
 0x7c2   :  { %v528_v51 = vpop.permute.xlu2 %527 }
 0x7c3   :  { %v530_v52 = vsel %vm91_vm3, %v676_v50, %v528_v51 }
 0x7c4   :  { %v532_v53 = vrot.slane %v530_v52, 6 }
 0x7c6   :  { %636 = vmatmul.msk.f32.vlgmr.msra.gmra.mxu1 %vm118_vm4, %v532_v53 }
 0x843   :  { %v552_v54 = vpop.f32.mrf.mxu1 }
 0x844   :  { %v553_v55 = vadd.f32 %v786_v18, %v552_v54 }
 0x846   :  { %677 = vtanh.f32 %v553_v55 }
 0x84c   :  { %v678_v56 = vpop.eup %677 }
 0x84d   :  { %v567_v57 = vrot.slane %v678_v56, 2 }
 0x84f   :  { %v576_v58 = vsel %vm572_vm7, %v575_v46, %v567_v57 }
 0x850   :  { %638 = vmatmul.msk.f32.gmra.mxu3 %vm91_vm3, %v576_v58 }
 0x8d3   :  { %v608_v59 = vpop.f32.mrf.mxu3 }
 0x8d4   :  { %v609_v60 = vadd.f32 %v646_v20, %v608_v59 }
 0x8d6   :  { %612 = vst.msk [vmem:[%s877_s8 + $0x8] sm:$0xff] %vm50_vm1, %v609_v60 }

</bundles_post_ra>
